<compile_context>
chip_gen: v5e
topology: v5e:2x2
jax: 0.10.0
libtpu: 0.0.40
codegen_flags: <defaults>
</compile_context>

<pallas_src>
import functools
import math

import numpy as np
import jax
import jax.numpy as jnp
from jax.experimental import pallas as pl
from jax.experimental.pallas import tpu as pltpu


# --------------------------------------------------------------------------
# Small helpers: VMEM budgeting + single-buffered constant-weight BlockSpecs
# --------------------------------------------------------------------------

def _round_up(x, m):
    return (x + m - 1) // m * m


_VMEM_CAP = None


def _vmem_cap_bytes():
    global _VMEM_CAP
    if _VMEM_CAP is None:
        try:
            _VMEM_CAP = int(pltpu.get_tpu_info().vmem_capacity_bytes)
        except Exception:
            _VMEM_CAP = 64 * 2**20          # conservative: v7x per-TC VMEM
    return _VMEM_CAP


def _vmem_limit(block_bytes):
    """Explicit scoped-VMEM request: never below 32 MiB (so we never shrink the
    compiler's default budget), never above ~85% of physical per-core VMEM."""
    return int(min(max(32 * 2**20, 2 * int(block_bytes)),
                   int(_vmem_cap_bytes() * 0.85)))


_BUFFERED1_OK = None


def _buffered1_supported():
    """One-time eager probe: does pipeline_mode=pl.Buffered(1) lower cleanly?"""
    global _BUFFERED1_OK
    if _BUFFERED1_OK is None:
        try:
            def _probe(w_ref, x_ref, o_ref):
                o_ref[...] = x_ref[...] + w_ref[...]

            x = jnp.zeros((16, 128), jnp.float32)
            w = jnp.ones((8, 128), jnp.float32)
            out = pl.pallas_call(
                _probe,
                out_shape=jax.ShapeDtypeStruct((16, 128), jnp.float32),
                grid=(2,),
                in_specs=[pl.BlockSpec((8, 128), lambda i: (0, 0),
                                       pipeline_mode=pl.Buffered(1)),
                          pl.BlockSpec((8, 128), lambda i: (i, 0))],
                out_specs=pl.BlockSpec((8, 128), lambda i: (i, 0)),
            )(w, x)
            jax.block_until_ready(out)
            _BUFFERED1_OK = True
        except Exception:
            _BUFFERED1_OK = False
    return _BUFFERED1_OK


def _const_spec(shape):
    """BlockSpec for a grid-constant operand (weights / biases / LN params):
    single-buffered when supported, halving its VMEM footprint."""
    ndim = len(shape)
    index_map = lambda *_: (0,) * ndim
    if _buffered1_supported():
        return pl.BlockSpec(shape, index_map, pipeline_mode=pl.Buffered(1))
    return pl.BlockSpec(shape, index_map)


# --------------------------------------------------------------------------
# Fused multi-head attention + residual + LayerNorm kernel
# grid = (batch, q-tiles); K/V cover the full key sequence per step.
# --------------------------------------------------------------------------

def _mha_ln_kernel(xq_ref, xkv_ref, bias_ref, wqkv_ref, bqkv_ref, wo_ref, bo_ref,
                   g_ref, beta_ref, o_ref, *, nhead, scale, causal, fuse_qkv, eps):
    f32 = jnp.float32
    bf16 = jnp.bfloat16
    xq = xq_ref[0]                       # (tq, D) bf16
    tq, D = xq.shape
    Dh = D // nhead

    wqkv = wqkv_ref[...]                 # (D, 3D) bf16
    bqkv = bqkv_ref[...]                 # (1, 3D) f32

    if fuse_qkv:
        # Self-attention without q tiling: one fused (D,3D) projection matmul.
        qkv = jnp.dot(xq, wqkv, preferred_element_type=f32) + bqkv
        qb = (qkv[:, :D] * scale).astype(bf16)       # softmax scale folded into q
        kb = qkv[:, D:2 * D].astype(bf16)
        vb = qkv[:, 2 * D:].astype(bf16)
        Sk = tq
    else:
        xkv = xkv_ref[0]                 # (Sk, D) bf16
        Sk = xkv.shape[0]
        qb = ((jnp.dot(xq, wqkv[:, :D], preferred_element_type=f32)
               + bqkv[:, :D]) * scale).astype(bf16)
        kv = jnp.dot(xkv, wqkv[:, D:], preferred_element_type=f32) + bqkv[:, D:]
        kb = kv[:, :D].astype(bf16)
        vb = kv[:, D:].astype(bf16)

    # Additive attention bias: per-batch key-padding vector (+ in-kernel causal mask).
    bias = bias_ref[0]                   # (1, Sk) f32, 0 / -1e9
    if causal:
        q0 = pl.program_id(1) * tq       # global query offset of this tile
        row = q0 + jax.lax.broadcasted_iota(jnp.int32, (tq, Sk), 0)
        col = jax.lax.broadcasted_iota(jnp.int32, (tq, Sk), 1)
        bias = bias + jnp.where(col > row, jnp.float32(-1e9), jnp.float32(0.0))

    # Per-head softmax(q k^T + bias) v.  Head outputs are concatenated into ONE
    # (tq, D) buffer so the output projection is a single D-deep matmul.
    dn_qkT = (((1,), (1,)), ((), ()))    # contract last dims -> q @ k^T, no transpose
    heads = []
    for h in range(nhead):
        sl = slice(h * Dh, (h + 1) * Dh)
        s = jax.lax.dot_general(qb[:, sl], kb[:, sl], dn_qkT,
                                preferred_element_type=f32) + bias    # (tq, Sk) f32
        m = jnp.max(s, axis=-1, keepdims=True)
        p = jnp.exp(s - m)
        p = p * pl.reciprocal(jnp.sum(p, axis=-1, keepdims=True), approx=True)
        heads.append(jnp.dot(p.astype(bf16), vb[:, sl],
                             preferred_element_type=f32))             # (tq, Dh)
    attn = jnp.concatenate(heads, axis=1).astype(bf16)                # (tq, D)
    attn = jnp.dot(attn, wo_ref[...], preferred_element_type=f32) + bo_ref[...]

    # Residual + LayerNorm (post-norm, f32 statistics).
    r = xq.astype(f32) + attn
    mean = jnp.mean(r, axis=-1, keepdims=True)
    var = jnp.mean(jnp.square(r - mean), axis=-1, keepdims=True)
    y = (r - mean) * jax.lax.rsqrt(var + eps) * g_ref[...] + beta_ref[...]
    o_ref[0] = y.astype(o_ref.dtype)


def fused_mha_layer(x_q, x_kv, pad_bias, p, *, nhead, causal, is_self, eps=1e-5):
    """x_q: (B, Sq, D) bf16, x_kv: (B, Sk, D) bf16, pad_bias: (B, 1, Sk) f32."""
    B, Sq, D = x_q.shape
    Sk = x_kv.shape[1]
    Dh = D // nhead

    # Query tile: largest power-of-two tile (<=512) dividing Sq, else the full Sq.
    tq = Sq
    for t in (512, 256, 128, 64, 32, 16, 8):
        if Sq % t == 0:
            tq = t
            break
    n_q = Sq // tq
    fuse_qkv = is_self and n_q == 1

    kernel = functools.partial(
        _mha_ln_kernel, nhead=nhead, scale=1.0 / math.sqrt(Dh),
        causal=causal, fuse_qkv=fuse_qkv, eps=eps)

    # VMEM budget from actual block footprints (weights single-buffered when possible).
    wbuf = 1 if _buffered1_supported() else 2
    weight_bytes = (D * 3 * D + D * D) * 2 + (3 * D + 3 * D) * 4
    act_bytes = 2 * (tq * D * 2) * 2 + 2 * (Sk * D * 2) + 2 * (Sk * 4)
    tmp_bytes = 3 * tq * Sk * 4 + tq * 3 * D * 4 + Sk * 2 * D * 4 + 2 * tq * D * 4
    limit = _vmem_limit(weight_bytes * wbuf + act_bytes + tmp_bytes)

    # TODO(synk): for very long sequences, stream K/V tiles with an online-softmax
    # scratch (flash-style k-axis "arbitrary" grid dim) instead of holding full Sk.
    return pl.pallas_call(
        kernel,
        out_shape=jax.ShapeDtypeStruct((B, Sq, D), jnp.bfloat16),
        grid=(B, n_q),
        in_specs=[
            pl.BlockSpec((1, tq, D), lambda b, q: (b, q, 0)),
            pl.BlockSpec((1, Sk, D), lambda b, q: (b, 0, 0)),
            pl.BlockSpec((1, 1, Sk), lambda b, q: (b, 0, 0)),
            _const_spec((D, 3 * D)),
            _const_spec((1, 3 * D)),
            _const_spec((D, D)),
            _const_spec((1, D)),
            _const_spec((1, D)),
            _const_spec((1, D)),
        ],
        out_specs=pl.BlockSpec((1, tq, D), lambda b, q: (b, q, 0)),
        compiler_params=pltpu.CompilerParams(
            dimension_semantics=("parallel", "parallel"),
            vmem_limit_bytes=limit),
    )(x_q, x_kv, pad_bias, p["w_qkv"], p["b_qkv"], p["wo"], p["bo"],
      p["ln_g"], p["ln_b"])


# --------------------------------------------------------------------------
# Fused FFN (Linear -> ReLU -> Linear) + residual + LayerNorm kernel
# --------------------------------------------------------------------------

def _ffn_ln_kernel(x_ref, w1_ref, b1_ref, w2_ref, b2_ref, g_ref, beta_ref, o_ref,
                   *, eps):
    f32 = jnp.float32
    x = x_ref[...]                                   # (tm, D) bf16
    h = jnp.dot(x, w1_ref[...], preferred_element_type=f32) + b1_ref[...]
    h = jnp.maximum(h, 0.0)                          # ReLU, intermediate stays in VMEM
    y = jnp.dot(h.astype(jnp.bfloat16), w2_ref[...], preferred_element_type=f32)
    y = y + b2_ref[...]
    r = x.astype(f32) + y                            # residual
    mean = jnp.mean(r, axis=-1, keepdims=True)
    var = jnp.mean(jnp.square(r - mean), axis=-1, keepdims=True)
    out = (r - mean) * jax.lax.rsqrt(var + eps) * g_ref[...] + beta_ref[...]
    o_ref[...] = out.astype(o_ref.dtype)


def fused_ffn_layer(x, p, eps=1e-5):
    B, S, D = x.shape
    FF = p["w1"].shape[1]
    M = B * S

    # Row tile: VMEM-budget cap (intermediate tm*FF f32 dominates), multiple of 8.
    cap = max(8, min(1024, ((20 * 2**20) // (4 * FF + 8 * D)) // 8 * 8))
    tm = None
    for t in (1024, 512, 256, 128, 64, 32, 16, 8):
        if t <= cap and M % t == 0:
            tm = t
            break
    if tm is None:                                   # no clean divisor: pad rows
        tm = min(cap, 512, _round_up(M, 8))
        M_pad = _round_up(M, tm)
    else:
        M_pad = M

    xf = x.reshape(M, D)
    if M_pad != M:
        xf = jnp.pad(xf, ((0, M_pad - M), (0, 0)))

    wbuf = 1 if _buffered1_supported() else 2
    weight_bytes = 2 * D * FF * 2 + (FF + 3 * D) * 4
    limit = _vmem_limit(weight_bytes * wbuf + 4 * tm * D * 2
                        + tm * FF * 4 + tm * D * 4)

    y = pl.pallas_call(
        functools.partial(_ffn_ln_kernel, eps=eps),
        out_shape=jax.ShapeDtypeStruct((M_pad, D), jnp.bfloat16),
        grid=(M_pad // tm,),
        in_specs=[
            pl.BlockSpec((tm, D), lambda i: (i, 0)),
            _const_spec((D, FF)),
            _const_spec((1, FF)),
            _const_spec((FF, D)),
            _const_spec((1, D)),
            _const_spec((1, D)),
            _const_spec((1, D)),
        ],
        out_specs=pl.BlockSpec((tm, D), lambda i: (i, 0)),
        compiler_params=pltpu.CompilerParams(
            dimension_semantics=("parallel",), vmem_limit_bytes=limit),
    )(xf, p["w1"], p["b1"], p["w2"], p["b2"], p["ln_g"], p["ln_b"])
    if M_pad != M:
        y = y[:M]
    return y.reshape(B, S, D)


# --------------------------------------------------------------------------
# Tiled matmul + bias (generator).  grid=(M/tm, N/tn, K/tk), f32 accumulator.
# --------------------------------------------------------------------------

def _matmul_bias_kernel(x_ref, w_ref, b_ref, o_ref, acc_ref):
    @pl.when(pl.program_id(2) == 0)
    def _():
        acc_ref[...] = jnp.zeros_like(acc_ref)

    acc_ref[...] += jnp.dot(x_ref[...], w_ref[...],
                            preferred_element_type=jnp.float32)

    @pl.when(pl.program_id(2) == pl.num_programs(2) - 1)
    def _():
        o_ref[...] = (acc_ref[...] + b_ref[...]).astype(o_ref.dtype)


def pallas_matmul_bias(x, w, b, out_dtype=jnp.bfloat16):
    M, K = x.shape
    N = w.shape[1]                                   # multiple of 128 (padded vocab)

    M_pad = _round_up(M, 8)
    if M_pad % 128 == 0:
        tm = 128
    elif M_pad <= 256:
        tm = M_pad
    else:
        M_pad = _round_up(M_pad, 128)
        tm = 128
    if M_pad != M:
        x = jnp.pad(x, ((0, M_pad - M), (0, 0)))

    tn = 512 if N % 512 == 0 else (256 if N % 256 == 0 else 128)
    tk = 512 if K % 512 == 0 else (256 if K % 256 == 0 else
                                   (128 if K % 128 == 0 else K))
    # TODO(synk): on v5e sweep tn/tk down to 256 and consider pl.Buffered(3) on the
    # (k,j)-varying weight operand to hide the lower HBM bandwidth.

    osz = np.dtype(out_dtype).itemsize
    limit = _vmem_limit(2 * (tm * tk * x.dtype.itemsize + tk * tn * w.dtype.itemsize
                             + tm * tn * osz) + tm * tn * 4 + 2 * tn * 4)

    out = pl.pallas_call(
        _matmul_bias_kernel,
        out_shape=jax.ShapeDtypeStruct((M_pad, N), out_dtype),
        grid=(M_pad // tm, N // tn, K // tk),
        in_specs=[
            pl.BlockSpec((tm, tk), lambda i, j, k: (i, k)),
            pl.BlockSpec((tk, tn), lambda i, j, k: (k, j)),
            pl.BlockSpec((1, tn), lambda i, j, k: (0, j)),
        ],
        out_specs=pl.BlockSpec((tm, tn), lambda i, j, k: (i, j)),
        scratch_shapes=[pltpu.VMEM((tm, tn), jnp.float32)],
        compiler_params=pltpu.CompilerParams(
            dimension_semantics=("parallel", "parallel", "arbitrary"),
            vmem_limit_bytes=limit),
    )(x, w, b)
    return out[:M] if M_pad != M else out


# --------------------------------------------------------------------------
# Transformer forward built from the fused kernels
# --------------------------------------------------------------------------

def transformer_forward(params, src, src_padding_mask, tgt, tgt_padding_mask):
    nhead = params["nhead"]
    vocab = params["vocab"]

    # Batch-first internal layout: (B, S, D).  Only the id tensors and the final
    # logits are transposed to match the PyTorch (S, B, ...) interface.
    src_ids = src.T                                   # (B, S_src)
    tgt_ids = tgt.T                                   # (B, S_tgt)
    B, S_src = src_ids.shape
    S_tgt = tgt_ids.shape[1]

    # Embedding lookup (gather) stays in XLA.
    # TODO(synk): if the supplied embedding layers include positional encoding /
    # sqrt(d_model) scaling, add them here (the container applies only the lookup).
    src_x = jnp.take(params["src_emb"], src_ids, axis=0).astype(jnp.bfloat16)
    tgt_x = jnp.take(params["tgt_emb"], tgt_ids, axis=0).astype(jnp.bfloat16)

    # Tiny per-batch additive key-padding bias (0 / -1e9), NOT replicated per head/query.
    src_bias = jnp.where(src_padding_mask, jnp.float32(-1e9),
                         jnp.float32(0.0))[:, None, :]         # (B, 1, S_src)
    tgt_bias = jnp.where(tgt_padding_mask, jnp.float32(-1e9),
                         jnp.float32(0.0))[:, None, :]         # (B, 1, S_tgt)

    # ---- encode ----
    memory = src_x
    for lp in params["encoder_layers"]:
        memory = fused_mha_layer(memory, memory, src_bias, lp["self_attn"],
                                 nhead=nhead, causal=False, is_self=True)
        memory = fused_ffn_layer(memory, lp["ffn"])

    # ---- decode ----
    x = tgt_x
    for lp in params["decoder_layers"]:
        x = fused_mha_layer(x, x, tgt_bias, lp["self_attn"],
                            nhead=nhead, causal=True, is_self=True)
        x = fused_mha_layer(x, memory, src_bias, lp["cross_attn"],
                            nhead=nhead, causal=False, is_self=False)
        x = fused_ffn_layer(x, lp["ffn"])

    # ---- generator (Linear d_model -> vocab; vocab padded to x128 for lane-dense
    # stores; bf16 writeback halves the HBM-bound output traffic) ----
    D = x.shape[-1]
    logits_p = pallas_matmul_bias(x.reshape(B * S_tgt, D),
                                  params["gen_w"], params["gen_b"])
    logits = logits_p[:, :vocab].astype(jnp.float32).reshape(B, S_tgt, vocab)
    return jnp.transpose(logits, (1, 0, 2))           # (S_tgt, B, vocab)


# --------------------------------------------------------------------------
# Deterministic synthetic parameters (xavier-uniform style), packed for kernels:
#   w_qkv (D, 3D) bf16  == torch MultiheadAttention in_proj_weight.T
# --------------------------------------------------------------------------

def _xavier(key, fan_in, fan_out):
    limit = math.sqrt(6.0 / (fan_in + fan_out))
    return jax.random.uniform(key, (fan_in, fan_out), jnp.float32, -limit, limit)


def _init_attn(key, d):
    ks = jax.random.split(key, 4)
    wq, wk, wv, wo = (_xavier(k, d, d) for k in ks)
    return dict(
        w_qkv=jnp.concatenate([wq, wk, wv], axis=1).astype(jnp.bfloat16),
        b_qkv=jnp.zeros((1, 3 * d), jnp.float32),
        wo=wo.astype(jnp.bfloat16),
        bo=jnp.zeros((1, d), jnp.float32),
        ln_g=jnp.ones((1, d), jnp.float32),
        ln_b=jnp.zeros((1, d), jnp.float32),
    )


def _init_ffn(key, d, ff):
    k1, k2 = jax.random.split(key)
    return dict(
        w1=_xavier(k1, d, ff).astype(jnp.bfloat16), b1=jnp.zeros((1, ff), jnp.float32),
        w2=_xavier(k2, ff, d).astype(jnp.bfloat16), b2=jnp.zeros((1, d), jnp.float32),
        ln_g=jnp.ones((1, d), jnp.float32), ln_b=jnp.zeros((1, d), jnp.float32),
    )


def _init_encoder_layer(key, d, ff):
    k1, k2 = jax.random.split(key)
    return dict(self_attn=_init_attn(k1, d), ffn=_init_ffn(k2, d, ff))


def _init_decoder_layer(key, d, ff):
    k1, k2, k3 = jax.random.split(key, 3)
    return dict(self_attn=_init_attn(k1, d), cross_attn=_init_attn(k2, d),
                ffn=_init_ffn(k3, d, ff))


def init_params(key, vocab, d_model, nhead, dim_ff, n_enc, n_dec):
    ks = jax.random.split(key, 3 + n_enc + n_dec)
    vocab_p = _round_up(vocab, 128)
    gen_w = _xavier(ks[2], d_model, vocab)
    gen_w = jnp.pad(gen_w, ((0, 0), (0, vocab_p - vocab))).astype(jnp.bfloat16)
    return dict(
        nhead=nhead,
        vocab=vocab,
        src_emb=0.02 * jax.random.normal(ks[0], (vocab, d_model), jnp.float32),
        tgt_emb=0.02 * jax.random.normal(ks[1], (vocab, d_model), jnp.float32),
        gen_w=gen_w,
        gen_b=jnp.zeros((1, vocab_p), jnp.float32),
        encoder_layers=[_init_encoder_layer(ks[3 + i], d_model, dim_ff)
                        for i in range(n_enc)],
        decoder_layers=[_init_decoder_layer(ks[3 + n_enc + i], d_model, dim_ff)
                        for i in range(n_dec)],
    )


# --------------------------------------------------------------------------

if __name__ == "__main__":
    # NOTE: at these demo shapes (d_model=32 < 128 lanes) every call is fixed-
    # overhead bound; the tiling logic targets realistic d_model/dim_ff/seq.
    vocab, d_model, nhead, dim_ff = 50, 32, 4, 64
    n_enc, n_dec = 2, 2
    S_src, S_tgt, B = 8, 8, 2

    _buffered1_supported()   # probe Buffered(1) support once, eagerly

    key = jax.random.PRNGKey(0)
    k_param, k_src, k_tgt = jax.random.split(key, 3)
    params = init_params(k_param, vocab, d_model, nhead, dim_ff, n_enc, n_dec)

    src = jax.random.randint(k_src, (S_src, B), 0, vocab, dtype=jnp.int32)
    tgt = jax.random.randint(k_tgt, (S_tgt, B), 0, vocab, dtype=jnp.int32)
    # True = padded key (ignored), matching PyTorch key_padding_mask semantics.
    src_padding_mask = jnp.zeros((B, S_src), jnp.bool_).at[1, -2:].set(True)
    tgt_padding_mask = jnp.zeros((B, S_tgt), jnp.bool_).at[1, -1:].set(True)

    logits = transformer_forward(params, src, src_padding_mask, tgt, tgt_padding_mask)
    logits = jax.block_until_ready(logits)

    assert logits.shape == (S_tgt, B, vocab), logits.shape
    assert bool(jnp.all(jnp.isfinite(logits)))
    print("KERNEL_OK")
</pallas_src>

<mosaic_0001>
module attributes {stable_mosaic.version = 11 : i64} {
  func.func @_probe(%arg0: i32, %arg1: memref<8x128xf32, #tpu.memory_space<vmem>>, %arg2: memref<8x128xf32, #tpu.memory_space<vmem>>, %arg3: memref<8x128xf32, #tpu.memory_space<vmem>>) attributes {dimension_semantics = [#tpu.dimension_semantics<arbitrary>], iteration_bounds = array<i64: 2>, scalar_prefetch = 0 : i64, scratch_operands = 0 : i64, tpu.core_type = #tpu.core_type<tc>, window_params = [{pipeline_mode = #tpu.pipeline_mode<synchronous>, transform_indices = @transform_0, window_bounds = array<i64: 8, 128>}, {transform_indices = @transform_1, window_bounds = array<i64: 8, 128>}, {transform_indices = @transform_2, window_bounds = array<i64: 8, 128>}]} {
    %c0 = arith.constant 0 : index
    %c0_0 = arith.constant 0 : index
    %0 = vector.load %arg2[%c0, %c0_0] : memref<8x128xf32, #tpu.memory_space<vmem>>, vector<8x128xf32>
    %c0_1 = arith.constant 0 : index
    %c0_2 = arith.constant 0 : index
    %1 = vector.load %arg1[%c0_1, %c0_2] : memref<8x128xf32, #tpu.memory_space<vmem>>, vector<8x128xf32>
    %2 = arith.addf %0, %1 : vector<8x128xf32>
    %c0_3 = arith.constant 0 : index
    %c0_4 = arith.constant 0 : index
    %3 = vector.load %arg3[%c0_3, %c0_4] : memref<8x128xf32, #tpu.memory_space<vmem>>, vector<8x128xf32>
    tpu.vector_store %arg3[%c0_3, %c0_4], %2 {strides = array<i32>} : memref<8x128xf32, #tpu.memory_space<vmem>>, vector<8x128xf32>,
    return
  }
  func.func @transform_0(%arg0: i32) -> (i32, i32) {
    %c0_i32 = arith.constant 0 : i32
    %c0_i32_0 = arith.constant 0 : i32
    %c0_i32_1 = arith.constant 0 : i32
    return %c0_i32, %c0_i32_0 : i32, i32
  }
  func.func @transform_1(%arg0: i32) -> (i32, i32) {
    %c0_i32 = arith.constant 0 : i32
    %c0_i32_0 = arith.constant 0 : i32
    return %arg0, %c0_i32 : i32, i32
  }
  func.func @transform_2(%arg0: i32) -> (i32, i32) {
    %c0_i32 = arith.constant 0 : i32
    %c0_i32_0 = arith.constant 0 : i32
    return %arg0, %c0_i32 : i32, i32
  }
}

module attributes {stable_mosaic.version = 11 : i64} {
  func.func @_mha_ln_kernel(%arg0: i32, %arg1: i32, %arg2: memref<1x8x32xbf16, #tpu.memory_space<vmem>>, %arg3: memref<1x8x32xbf16, #tpu.memory_space<vmem>>, %arg4: memref<1x1x8xf32, #tpu.memory_space<vmem>>, %arg5: memref<32x96xbf16, #tpu.memory_space<vmem>>, %arg6: memref<1x96xf32, #tpu.memory_space<vmem>>, %arg7: memref<32x32xbf16, #tpu.memory_space<vmem>>, %arg8: memref<1x32xf32, #tpu.memory_space<vmem>>, %arg9: memref<1x32xf32, #tpu.memory_space<vmem>>, %arg10: memref<1x32xf32, #tpu.memory_space<vmem>>, %arg11: memref<1x8x32xbf16, #tpu.memory_space<vmem>>) attributes {dimension_semantics = [#tpu.dimension_semantics<parallel>, #tpu.dimension_semantics<parallel>], iteration_bounds = array<i64: 2, 1>, scalar_prefetch = 0 : i64, scratch_operands = 0 : i64, tpu.core_type = #tpu.core_type<tc>, window_params = [{transform_indices = @transform_0, window_bounds = array<i64: 1, 8, 32>}, {transform_indices = @transform_1, window_bounds = array<i64: 1, 8, 32>}, {transform_indices = @transform_2, window_bounds = array<i64: 1, 1, 8>}, {pipeline_mode = #tpu.pipeline_mode<synchronous>, transform_indices = @transform_3, window_bounds = array<i64: 32, 96>}, {pipeline_mode = #tpu.pipeline_mode<synchronous>, transform_indices = @transform_4, window_bounds = array<i64: 1, 96>}, {pipeline_mode = #tpu.pipeline_mode<synchronous>, transform_indices = @transform_5, window_bounds = array<i64: 32, 32>}, {pipeline_mode = #tpu.pipeline_mode<synchronous>, transform_indices = @transform_6, window_bounds = array<i64: 1, 32>}, {pipeline_mode = #tpu.pipeline_mode<synchronous>, transform_indices = @transform_7, window_bounds = array<i64: 1, 32>}, {pipeline_mode = #tpu.pipeline_mode<synchronous>, transform_indices = @transform_8, window_bounds = array<i64: 1, 32>}, {transform_indices = @transform_9, window_bounds = array<i64: 1, 8, 32>}]} {
    %c0 = arith.constant 0 : index
    %c0_0 = arith.constant 0 : index
    %c0_1 = arith.constant 0 : index
    %0 = vector.load %arg2[%c0, %c0_0, %c0_1] : memref<1x8x32xbf16, #tpu.memory_space<vmem>>, vector<1x8x32xbf16>
    %1 = vector.shape_cast %0 : vector<1x8x32xbf16> to vector<8x32xbf16>
    %c0_2 = arith.constant 0 : index
    %c0_3 = arith.constant 0 : index
    %2 = vector.load %arg5[%c0_2, %c0_3] : memref<32x96xbf16, #tpu.memory_space<vmem>>, vector<32x96xbf16>
    %c0_4 = arith.constant 0 : index
    %c0_5 = arith.constant 0 : index
    %3 = vector.load %arg6[%c0_4, %c0_5] : memref<1x96xf32, #tpu.memory_space<vmem>>, vector<1x96xf32>
    %cst = arith.constant dense<0.000000e+00> : vector<8x96xf32>
    %4 = tpu.matmul %1, %2, %cst {dimension_numbers = #tpu.dot_dimension_numbers<[1], [0], [0], [1], [0, 0, 1, 1], [], []>} : vector<8x32xbf16>, vector<32x96xbf16>, vector<8x96xf32> -> vector<8x96xf32>
    %5 = vector.broadcast %3 : vector<1x96xf32> to vector<8x96xf32>
    %6 = arith.addf %4, %5 : vector<8x96xf32>
    %7 = vector.extract_strided_slice %6 {offsets = [0, 0], sizes = [8, 32], strides = [1, 1]} : vector<8x96xf32> to vector<8x32xf32>
    %cst_6 = arith.constant 0.353553385 : f32
    %8 = vector.broadcast %cst_6 : f32 to vector<8x32xf32>
    %9 = arith.mulf %7, %8 : vector<8x32xf32>
    %10 = arith.truncf %9 : vector<8x32xf32> to vector<8x32xbf16>
    %11 = vector.extract_strided_slice %6 {offsets = [0, 32], sizes = [8, 32], strides = [1, 1]} : vector<8x96xf32> to vector<8x32xf32>
    %12 = arith.truncf %11 : vector<8x32xf32> to vector<8x32xbf16>
    %13 = vector.extract_strided_slice %6 {offsets = [0, 64], sizes = [8, 32], strides = [1, 1]} : vector<8x96xf32> to vector<8x32xf32>
    %14 = arith.truncf %13 : vector<8x32xf32> to vector<8x32xbf16>
    %c0_7 = arith.constant 0 : index
    %c0_8 = arith.constant 0 : index
    %c0_9 = arith.constant 0 : index
    %15 = vector.load %arg4[%c0_7, %c0_8, %c0_9] : memref<1x1x8xf32, #tpu.memory_space<vmem>>, vector<1x1x8xf32>
    %16 = vector.shape_cast %15 : vector<1x1x8xf32> to vector<1x8xf32>
    %17 = vector.extract_strided_slice %10 {offsets = [0, 0], sizes = [8, 8], strides = [1, 1]} : vector<8x32xbf16> to vector<8x8xbf16>
    %18 = vector.extract_strided_slice %12 {offsets = [0, 0], sizes = [8, 8], strides = [1, 1]} : vector<8x32xbf16> to vector<8x8xbf16>
    %cst_10 = arith.constant dense<0.000000e+00> : vector<8x8xf32>
    %19 = tpu.matmul %17, %18, %cst_10 {dimension_numbers = #tpu.dot_dimension_numbers<[1], [1], [0], [0], [0, 0, 1, 0], [], []>} : vector<8x8xbf16>, vector<8x8xbf16>, vector<8x8xf32> -> vector<8x8xf32>
    %20 = vector.broadcast %16 : vector<1x8xf32> to vector<8x8xf32>
    %21 = arith.addf %19, %20 : vector<8x8xf32>
    %cst_11 = arith.constant dense<0xFF800000> : vector<8xf32>
    %22 = vector.multi_reduction <maximumf>, %21, %cst_11 [1] : vector<8x8xf32> to vector<8xf32>
    %23 = vector.shape_cast %22 : vector<8xf32> to vector<8x1xf32>
    %24 = vector.broadcast %23 : vector<8x1xf32> to vector<8x8xf32>
    %25 = arith.subf %21, %24 : vector<8x8xf32>
    %26 = math.exp %25 : vector<8x8xf32>
    %cst_12 = arith.constant dense<0.000000e+00> : vector<8xf32>
    %27 = vector.multi_reduction <add>, %26, %cst_12 [1] : vector<8x8xf32> to vector<8xf32>
    %28 = vector.shape_cast %27 : vector<8xf32> to vector<8x1xf32>
    %29 = tpu.reciprocal %28 {approx = true} : vector<8x1xf32> -> vector<8x1xf32>
    %30 = vector.broadcast %29 : vector<8x1xf32> to vector<8x8xf32>
    %31 = arith.mulf %26, %30 : vector<8x8xf32>
    %32 = arith.truncf %31 : vector<8x8xf32> to vector<8x8xbf16>
    %33 = vector.extract_strided_slice %14 {offsets = [0, 0], sizes = [8, 8], strides = [1, 1]} : vector<8x32xbf16> to vector<8x8xbf16>
    %cst_13 = arith.constant dense<0.000000e+00> : vector<8x8xf32>
    %34 = tpu.matmul %32, %33, %cst_13 {dimension_numbers = #tpu.dot_dimension_numbers<[1], [0], [0], [1], [0, 0, 1, 1], [], []>} : vector<8x8xbf16>, vector<8x8xbf16>, vector<8x8xf32> -> vector<8x8xf32>
    %35 = vector.extract_strided_slice %10 {offsets = [0, 8], sizes = [8, 8], strides = [1, 1]} : vector<8x32xbf16> to vector<8x8xbf16>
    %36 = vector.extract_strided_slice %12 {offsets = [0, 8], sizes = [8, 8], strides = [1, 1]} : vector<8x32xbf16> to vector<8x8xbf16>
    %cst_14 = arith.constant dense<0.000000e+00> : vector<8x8xf32>
    %37 = tpu.matmul %35, %36, %cst_14 {dimension_numbers = #tpu.dot_dimension_numbers<[1], [1], [0], [0], [0, 0, 1, 0], [], []>} : vector<8x8xbf16>, vector<8x8xbf16>, vector<8x8xf32> -> vector<8x8xf32>
    %38 = vector.broadcast %16 : vector<1x8xf32> to vector<8x8xf32>
    %39 = arith.addf %37, %38 : vector<8x8xf32>
    %cst_15 = arith.constant dense<0xFF800000> : vector<8xf32>
    %40 = vector.multi_reduction <maximumf>, %39, %cst_15 [1] : vector<8x8xf32> to vector<8xf32>
    %41 = vector.shape_cast %40 : vector<8xf32> to vector<8x1xf32>
    %42 = vector.broadcast %41 : vector<8x1xf32> to vector<8x8xf32>
    %43 = arith.subf %39, %42 : vector<8x8xf32>
    %44 = math.exp %43 : vector<8x8xf32>
    %cst_16 = arith.constant dense<0.000000e+00> : vector<8xf32>
    %45 = vector.multi_reduction <add>, %44, %cst_16 [1] : vector<8x8xf32> to vector<8xf32>
    %46 = vector.shape_cast %45 : vector<8xf32> to vector<8x1xf32>
    %47 = tpu.reciprocal %46 {approx = true} : vector<8x1xf32> -> vector<8x1xf32>
    %48 = vector.broadcast %47 : vector<8x1xf32> to vector<8x8xf32>
    %49 = arith.mulf %44, %48 : vector<8x8xf32>
    %50 = arith.truncf %49 : vector<8x8xf32> to vector<8x8xbf16>
    %51 = vector.extract_strided_slice %14 {offsets = [0, 8], sizes = [8, 8], strides = [1, 1]} : vector<8x32xbf16> to vector<8x8xbf16>
    %cst_17 = arith.constant dense<0.000000e+00> : vector<8x8xf32>
    %52 = tpu.matmul %50, %51, %cst_17 {dimension_numbers = #tpu.dot_dimension_numbers<[1], [0], [0], [1], [0, 0, 1, 1], [], []>} : vector<8x8xbf16>, vector<8x8xbf16>, vector<8x8xf32> -> vector<8x8xf32>
    %53 = vector.extract_strided_slice %10 {offsets = [0, 16], sizes = [8, 8], strides = [1, 1]} : vector<8x32xbf16> to vector<8x8xbf16>
    %54 = vector.extract_strided_slice %12 {offsets = [0, 16], sizes = [8, 8], strides = [1, 1]} : vector<8x32xbf16> to vector<8x8xbf16>
    %cst_18 = arith.constant dense<0.000000e+00> : vector<8x8xf32>
    %55 = tpu.matmul %53, %54, %cst_18 {dimension_numbers = #tpu.dot_dimension_numbers<[1], [1], [0], [0], [0, 0, 1, 0], [], []>} : vector<8x8xbf16>, vector<8x8xbf16>, vector<8x8xf32> -> vector<8x8xf32>
    %56 = vector.broadcast %16 : vector<1x8xf32> to vector<8x8xf32>
    %57 = arith.addf %55, %56 : vector<8x8xf32>
    %cst_19 = arith.constant dense<0xFF800000> : vector<8xf32>
    %58 = vector.multi_reduction <maximumf>, %57, %cst_19 [1] : vector<8x8xf32> to vector<8xf32>
    %59 = vector.shape_cast %58 : vector<8xf32> to vector<8x1xf32>
    %60 = vector.broadcast %59 : vector<8x1xf32> to vector<8x8xf32>
    %61 = arith.subf %57, %60 : vector<8x8xf32>
    %62 = math.exp %61 : vector<8x8xf32>
    %cst_20 = arith.constant dense<0.000000e+00> : vector<8xf32>
    %63 = vector.multi_reduction <add>, %62, %cst_20 [1] : vector<8x8xf32> to vector<8xf32>
    %64 = vector.shape_cast %63 : vector<8xf32> to vector<8x1xf32>
    %65 = tpu.reciprocal %64 {approx = true} : vector<8x1xf32> -> vector<8x1xf32>
    %66 = vector.broadcast %65 : vector<8x1xf32> to vector<8x8xf32>
    %67 = arith.mulf %62, %66 : vector<8x8xf32>
    %68 = arith.truncf %67 : vector<8x8xf32> to vector<8x8xbf16>
    %69 = vector.extract_strided_slice %14 {offsets = [0, 16], sizes = [8, 8], strides = [1, 1]} : vector<8x32xbf16> to vector<8x8xbf16>
    %cst_21 = arith.constant dense<0.000000e+00> : vector<8x8xf32>
    %70 = tpu.matmul %68, %69, %cst_21 {dimension_numbers = #tpu.dot_dimension_numbers<[1], [0], [0], [1], [0, 0, 1, 1], [], []>} : vector<8x8xbf16>, vector<8x8xbf16>, vector<8x8xf32> -> vector<8x8xf32>
    %71 = vector.extract_strided_slice %10 {offsets = [0, 24], sizes = [8, 8], strides = [1, 1]} : vector<8x32xbf16> to vector<8x8xbf16>
    %72 = vector.extract_strided_slice %12 {offsets = [0, 24], sizes = [8, 8], strides = [1, 1]} : vector<8x32xbf16> to vector<8x8xbf16>
    %cst_22 = arith.constant dense<0.000000e+00> : vector<8x8xf32>
    %73 = tpu.matmul %71, %72, %cst_22 {dimension_numbers = #tpu.dot_dimension_numbers<[1], [1], [0], [0], [0, 0, 1, 0], [], []>} : vector<8x8xbf16>, vector<8x8xbf16>, vector<8x8xf32> -> vector<8x8xf32>
    %74 = vector.broadcast %16 : vector<1x8xf32> to vector<8x8xf32>
    %75 = arith.addf %73, %74 : vector<8x8xf32>
    %cst_23 = arith.constant dense<0xFF800000> : vector<8xf32>
    %76 = vector.multi_reduction <maximumf>, %75, %cst_23 [1] : vector<8x8xf32> to vector<8xf32>
    %77 = vector.shape_cast %76 : vector<8xf32> to vector<8x1xf32>
    %78 = vector.broadcast %77 : vector<8x1xf32> to vector<8x8xf32>
    %79 = arith.subf %75, %78 : vector<8x8xf32>
    %80 = math.exp %79 : vector<8x8xf32>
    %cst_24 = arith.constant dense<0.000000e+00> : vector<8xf32>
    %81 = vector.multi_reduction <add>, %80, %cst_24 [1] : vector<8x8xf32> to vector<8xf32>
    %82 = vector.shape_cast %81 : vector<8xf32> to vector<8x1xf32>
    %83 = tpu.reciprocal %82 {approx = true} : vector<8x1xf32> -> vector<8x1xf32>
    %84 = vector.broadcast %83 : vector<8x1xf32> to vector<8x8xf32>
    %85 = arith.mulf %80, %84 : vector<8x8xf32>
    %86 = arith.truncf %85 : vector<8x8xf32> to vector<8x8xbf16>
    %87 = vector.extract_strided_slice %14 {offsets = [0, 24], sizes = [8, 8], strides = [1, 1]} : vector<8x32xbf16> to vector<8x8xbf16>
    %cst_25 = arith.constant dense<0.000000e+00> : vector<8x8xf32>
    %88 = tpu.matmul %86, %87, %cst_25 {dimension_numbers = #tpu.dot_dimension_numbers<[1], [0], [0], [1], [0, 0, 1, 1], [], []>} : vector<8x8xbf16>, vector<8x8xbf16>, vector<8x8xf32> -> vector<8x8xf32>
    %89 = tpu.concatenate %34, %52, %70, %88 in 1 : vector<8x8xf32>, vector<8x8xf32>, vector<8x8xf32>, vector<8x8xf32> -> vector<8x32xf32>
    %90 = arith.truncf %89 : vector<8x32xf32> to vector<8x32xbf16>
    %c0_26 = arith.constant 0 : index
    %c0_27 = arith.constant 0 : index
    %91 = vector.load %arg7[%c0_26, %c0_27] : memref<32x32xbf16, #tpu.memory_space<vmem>>, vector<32x32xbf16>
    %cst_28 = arith.constant dense<0.000000e+00> : vector<8x32xf32>
    %92 = tpu.matmul %90, %91, %cst_28 {dimension_numbers = #tpu.dot_dimension_numbers<[1], [0], [0], [1], [0, 0, 1, 1], [], []>} : vector<8x32xbf16>, vector<32x32xbf16>, vector<8x32xf32> -> vector<8x32xf32>
    %c0_29 = arith.constant 0 : index
    %c0_30 = arith.constant 0 : index
    %93 = vector.load %arg8[%c0_29, %c0_30] : memref<1x32xf32, #tpu.memory_space<vmem>>, vector<1x32xf32>
    %94 = vector.broadcast %93 : vector<1x32xf32> to vector<8x32xf32>
    %95 = arith.addf %92, %94 : vector<8x32xf32>
    %96 = arith.extf %1 : vector<8x32xbf16> to vector<8x32xf32>
    %97 = arith.addf %96, %95 : vector<8x32xf32>
    %cst_31 = arith.constant dense<0.000000e+00> : vector<8xf32>
    %98 = vector.multi_reduction <add>, %97, %cst_31 [1] : vector<8x32xf32> to vector<8xf32>
    %99 = vector.shape_cast %98 : vector<8xf32> to vector<8x1xf32>
    %cst_32 = arith.constant 3.200000e+01 : f32
    %100 = vector.broadcast %cst_32 : f32 to vector<8x1xf32>
    %101 = arith.divf %99, %100 : vector<8x1xf32>
    %102 = vector.broadcast %101 : vector<8x1xf32> to vector<8x32xf32>
    %103 = arith.subf %97, %102 : vector<8x32xf32>
    %104 = arith.mulf %103, %103 : vector<8x32xf32>
    %cst_33 = arith.constant dense<0.000000e+00> : vector<8xf32>
    %105 = vector.multi_reduction <add>, %104, %cst_33 [1] : vector<8x32xf32> to vector<8xf32>
    %106 = vector.shape_cast %105 : vector<8xf32> to vector<8x1xf32>
    %cst_34 = arith.constant 3.200000e+01 : f32
    %107 = vector.broadcast %cst_34 : f32 to vector<8x1xf32>
    %108 = arith.divf %106, %107 : vector<8x1xf32>
    %109 = vector.broadcast %101 : vector<8x1xf32> to vector<8x32xf32>
    %110 = arith.subf %97, %109 : vector<8x32xf32>
    %cst_35 = arith.constant 9.99999974E-6 : f32
    %111 = vector.broadcast %cst_35 : f32 to vector<8x1xf32>
    %112 = arith.addf %108, %111 : vector<8x1xf32>
    %113 = math.rsqrt %112 : vector<8x1xf32>
    %114 = vector.broadcast %113 : vector<8x1xf32> to vector<8x32xf32>
    %115 = arith.mulf %110, %114 : vector<8x32xf32>
    %c0_36 = arith.constant 0 : index
    %c0_37 = arith.constant 0 : index
    %116 = vector.load %arg9[%c0_36, %c0_37] : memref<1x32xf32, #tpu.memory_space<vmem>>, vector<1x32xf32>
    %117 = vector.broadcast %116 : vector<1x32xf32> to vector<8x32xf32>
    %118 = arith.mulf %115, %117 : vector<8x32xf32>
    %c0_38 = arith.constant 0 : index
    %c0_39 = arith.constant 0 : index
    %119 = vector.load %arg10[%c0_38, %c0_39] : memref<1x32xf32, #tpu.memory_space<vmem>>, vector<1x32xf32>
    %120 = vector.broadcast %119 : vector<1x32xf32> to vector<8x32xf32>
    %121 = arith.addf %118, %120 : vector<8x32xf32>
    %122 = arith.truncf %121 : vector<8x32xf32> to vector<8x32xbf16>
    %c0_40 = arith.constant 0 : index
    %c0_41 = arith.constant 0 : index
    %c0_42 = arith.constant 0 : index
    %123 = vector.load %arg11[%c0_40, %c0_41, %c0_42] : memref<1x8x32xbf16, #tpu.memory_space<vmem>>, vector<1x8x32xbf16>
    %124 = vector.shape_cast %123 : vector<1x8x32xbf16> to vector<8x32xbf16>
    %125 = vector.shape_cast %122 : vector<8x32xbf16> to vector<1x8x32xbf16>
    tpu.vector_store %arg11[%c0_40, %c0_41, %c0_42], %125 {strides = array<i32>} : memref<1x8x32xbf16, #tpu.memory_space<vmem>>, vector<1x8x32xbf16>,
    return
  }
  func.func @transform_0(%arg0: i32, %arg1: i32) -> (i32, i32, i32) {
    %c0_i32 = arith.constant 0 : i32
    %c0_i32_0 = arith.constant 0 : i32
    return %arg0, %arg1, %c0_i32 : i32, i32, i32
  }
  func.func @transform_1(%arg0: i32, %arg1: i32) -> (i32, i32, i32) {
    %c0_i32 = arith.constant 0 : i32
    %c0_i32_0 = arith.constant 0 : i32
    %c0_i32_1 = arith.constant 0 : i32
    return %arg0, %c0_i32, %c0_i32_0 : i32, i32, i32
  }
  func.func @transform_2(%arg0: i32, %arg1: i32) -> (i32, i32, i32) {
    %c0_i32 = arith.constant 0 : i32
    %c0_i32_0 = arith.constant 0 : i32
    %c0_i32_1 = arith.constant 0 : i32
    return %arg0, %c0_i32, %c0_i32_0 : i32, i32, i32
  }
  func.func @transform_3(%arg0: i32, %arg1: i32) -> (i32, i32) {
    %c0_i32 = arith.constant 0 : i32
    %c0_i32_0 = arith.constant 0 : i32
    %c0_i32_1 = arith.constant 0 : i32
    return %c0_i32, %c0_i32_0 : i32, i32
  }
  func.func @transform_4(%arg0: i32, %arg1: i32) -> (i32, i32) {
    %c0_i32 = arith.constant 0 : i32
    %c0_i32_0 = arith.constant 0 : i32
    %c0_i32_1 = arith.constant 0 : i32
    return %c0_i32, %c0_i32_0 : i32, i32
  }
  func.func @transform_5(%arg0: i32, %arg1: i32) -> (i32, i32) {
    %c0_i32 = arith.constant 0 : i32
    %c0_i32_0 = arith.constant 0 : i32
    %c0_i32_1 = arith.constant 0 : i32
    return %c0_i32, %c0_i32_0 : i32, i32
  }
  func.func @transform_6(%arg0: i32, %arg1: i32) -> (i32, i32) {
    %c0_i32 = arith.constant 0 : i32
    %c0_i32_0 = arith.constant 0 : i32
    %c0_i32_1 = arith.constant 0 : i32
    return %c0_i32, %c0_i32_0 : i32, i32
  }
  func.func @transform_7(%arg0: i32, %arg1: i32) -> (i32, i32) {
    %c0_i32 = arith.constant 0 : i32
    %c0_i32_0 = arith.constant 0 : i32
    %c0_i32_1 = arith.constant 0 : i32
    return %c0_i32, %c0_i32_0 : i32, i32
  }
  func.func @transform_8(%arg0: i32, %arg1: i32) -> (i32, i32) {
    %c0_i32 = arith.constant 0 : i32
    %c0_i32_0 = arith.constant 0 : i32
    %c0_i32_1 = arith.constant 0 : i32
    return %c0_i32, %c0_i32_0 : i32, i32
  }
  func.func @transform_9(%arg0: i32, %arg1: i32) -> (i32, i32, i32) {
    %c0_i32 = arith.constant 0 : i32
    %c0_i32_0 = arith.constant 0 : i32
    return %arg0, %arg1, %c0_i32 : i32, i32, i32
  }
}

</mosaic_0001>

<bundles_post_ra>
// kernel: tpu_custom_call.1
= control target key start
LH: loop header
LB: loop body
LE: loop exit
PB: predicated region body
PF: predicated region fallthrough
CT: control target
= control target key end

     0   :  { %7 = vsyncpa [#allocation3], 0  ;;  %s635_s0 = inlined_call_operand.hbm [shape: f32[8,128], index: 0, kind: input, shape index: {}]   ;;  %s636_s1 = inlined_call_operand.hbm [shape: f32[16,128], index: 1, kind: input, shape index: {}]   ;;  %s637_s2 = inlined_call_operand.hbm [shape: f32[16,128], index: 2, kind: output, shape index: {}]  }
   0x1   :  { %8 = vsyncpa [#allocation6], 0 }
   0x2   :  { %10 = vsyncpa [#allocation6 + $0x1], 0 }
   0x3   :  { %11 = vsyncpa [#allocation4], 0 }
   0x4   :  { %13 = vsyncpa [#allocation4 + $0x1], 0  ;;  %s497_s9 = smov 0   ;;  %s499_s10 = smov 0  }
   0x5   :  { %s501_s11 = smov 0   ;;  %s503_s12 = smov 0  }
   0x6 LB: > { %s518_s13 = sadd.s32 4294967295, %s479_s12   ;;  %s278_s14 = sadd.s32 4294967294, %s479_s12   ;;  %s479_s12 = sphi %s503_s12, %s647_s12   ;;  %s475_s11 = sphi %s501_s11, %s646_s11   ;;  %s471_s10 = sphi %s499_s10, %s645_s10   ;;  %s467_s9 = sphi %s497_s9, %s644_s9  }
   0x7   : > { %p60_p0 = scmp.ne.s32.totalorder %s471_s10, %s467_s9  ;;  %p61_p1 = scmp.eq.s32.totalorder %s518_s13, 0 }
   0x8   : > { %p84_p2 = scmp.eq.s32.totalorder %s518_s13, 1  ;;  %p90_p3 = scmp.eq.s32.totalorder %s278_s14, 1 }
   0x9   : > { %p527_p4 = por %p61_p1, %p60_p0  ;;  %p279_p5 = scmp.ge.s32.totalorder %s479_s12, 1 }
   0xa   : > { %p532_p6 = por %p90_p3, %p60_p0  ;;  %p97_p7 = scmp.lt.s32.totalorder %s479_s12, 3 }
   0xb   : > { %s109_s19 = sshll.u32 %s635_s0, 4  ;;  %s481_s21 = smov [#allocation2]   ;;  %s110_s19 = int_to_ptr.hbm [resolvable:$true] %s109_s19 }
   0xc   : > { %p540_p8 = pnand %p279_p5, %p97_p7  ;;  %s111_s22 = sshll.u32 %s481_s21, 4  ;;  %s112_s22 = int_to_ptr.vmem [resolvable:$true] %s111_s22 }
   0xd   : > { %s550_s23 = sadd.s32 1, %s479_s12   ;;  %s47_s24 = sadd.s32 1, %s475_s11 }
   0xe   : > { %p300_p10 = pneg %p540_p8  ;;  %s44_s25 = ssub.s32 %s479_s12, %s550_s23 }
   0xf   : > { %p45_p12 = scmp.eq.s32.totalorder %s44_s25, 0  ;;  %p54_p13 = scmp.ne.s32.totalorder %s475_s11, %s471_s10 }
  0x10   : > { %p301_p11 = pnand %p300_p10, %p61_p1  ;;  %p55_p0 = scmp.eq.s32.totalorder %s479_s12, 0 }
  0x11   : > { %s559_s26 = scalar_select %p45_p12, %s475_s11, %s47_s24  }
  0x12   : > { %303 = dma.hbm_to_vmem [thread:$0]  (!%p301_p11), %s110_s19, 128, %s112_s22, [#allocation3]  }
  0x13   : > { %p563_p3 = por %p84_p2, %p54_p13  ;;  %p313_p5 = scmp.lt.s32.totalorder %s479_s12, 2 }
  0x14   : > { %s122_s28 = sand.u32 1, %s475_s11   ;;  %s283_s29 = sshll.u32 %s479_s12, 3 }
  0x15   : > { %p56_p7 = por %p55_p0, %p54_p13  ;;  %s282_s30 = sshll.u32 %s122_s28, 3 }
  0x16   : > { %s130_s5 = scalar_lea.hbm %s636_s1, %s283_s29  ;;  %s126_s7 = scalar_lea.vmem [#allocation5], %s282_s30 }
  0x17   : > { %s132_s6 = sshll.u32 %s130_s5, 4  ;;  %s134_s8 = sshll.u32 %s126_s7, 4  ;;  %s133_s6 = int_to_ptr.hbm [resolvable:$true] %s132_s6  ;;  %s135_s8 = int_to_ptr.vmem [resolvable:$true] %s134_s8 }
  0x18   : > { %p573_p10 = pnand %p313_p5, %p56_p7  ;;  %s123_s17 = scalar_lea.sflag [#allocation6], %s122_s28 }
  0x19   : > { %s379_s18 = sshra.s32 %s133_s6, 4  ;;  %s386_s24 = scalar_lea.hbm %s636_s1, 16  ;;  %s380_s18 = int_to_ptr.hbm [resolvable:$true] %s379_s18 }
  0x1a   : > { %s381_s19 = scalar_lea.hbm %s380_s18, 8  ;;  %p383_p11 = pneg %p573_p10 }
  0x1b   : > { %p382_p2 = scmp.ne.s32.totalorder %s380_s18, %s381_s19  ;;  %p387_p0 = scmp.lt.s32.totalorder %s380_s18, %s636_s1 }
  0x1c   : > { %p388_p5 = scmp.lt.s32.totalorder %s386_s24, %s381_s19 }
  0x1d   : > { %p384_p12 = pnand %p383_p11, %p382_p2 }
  0x1e   : > { %p389_p7 = por %p388_p5, %p387_p0 }
  0x1f   : > { %p385_p13 = pneg %p384_p12 }
  0x21   : > { %p390_p9 = pnand %p389_p7, %p385_p13 }
  0x23   : > { %393 = shalt.err (!%p390_p9)
}
  0x24   : > { %307 = dma.hbm_to_vmem [thread:$0]  (!%p573_p10), %s133_s6, 128, %s135_s8, %s123_s17  }
  0x25   : > { %143 = sbr.rel (%p540_p8) target bundleno = 62 (0x3e), region = 28 }
  0x2a   : > { %454 = dma.done.wait (%p61_p1), [#allocation3], 128  }
  0x2b   : > { %456 = vsyncadd (%p61_p1), [#allocation3], 4294967168  ;;  %s594_s28 = sand.u32 1, %s471_s10  }
  0x2c   : > { %s286_s30 = sshll.u32 %s594_s28, 3  ;;  %s151_s3 = scalar_lea.sflag [#allocation6], %s594_s28 }
  0x2d   : > { %s154_s4 = scalar_lea.vmem [#allocation5], %s286_s30 }
  0x2e   : > { %458 = dma.done.wait (%p527_p4), %s151_s3, 128  }
  0x2f   : > { %460 = vsyncadd (%p527_p4), %s151_s3, 4294967168  ;;  %s289_s20 = sshll.u32 %s518_s13, 3  ;;  %s175_s8 = scalar_lea.vmem [#allocation7], %s286_s30  ;;  %v176_v0 = vld [vmem:[%s154_s4] sm:$0xff]  ;;  %v177_v1 = vld [vmem:[#allocation2] sm:$0xff] }
  0x30   : > { %s191_s7 = scalar_lea.hbm %s637_s2, %s289_s20  ;;  %s193_s14 = sshll.u32 %s175_s8, 4  ;;  %v178_v2 = vadd.f32 %v177_v1, %v176_v0  ;;  %s194_s14 = int_to_ptr.vmem [resolvable:$true] %s193_s14 }
  0x31   : > { %s195_s17 = sshll.u32 %s191_s7, 4  ;;  %s181_s18 = scalar_lea.sflag [#allocation4], %s594_s28  ;;  %s196_s17 = int_to_ptr.hbm [resolvable:$true] %s195_s17 }
  0x32   : > { %179 = vst [vmem:[%s175_s8] sm:$0xff] %v178_v2  ;;  %s423_s15 = sshra.s32 %s196_s17, 4  ;;  %s429_s22 = scalar_lea.hbm %s637_s2, 16  ;;  %s424_s15 = int_to_ptr.hbm [resolvable:$true] %s423_s15 }
  0x33   : > { %s425_s19 = scalar_lea.hbm %s424_s15, 8  ;;  %p430_p9 = scmp.lt.s32.totalorder %s424_s15, %s637_s2 }
  0x34   : > { %p426_p1 = scmp.ne.s32.totalorder %s424_s15, %s425_s19  ;;  %p431_p10 = scmp.lt.s32.totalorder %s429_s22, %s425_s19 }
  0x36   : > { %p427_p4 = pnand %p426_p1, %p563_p3  ;;  %p432_p2 = por %p431_p10, %p430_p9 }
  0x38   : > { %p428_p8 = pneg %p427_p4 }
  0x3a   : > { %p433_p11 = pnand %p432_p2, %p428_p8 }
  0x3c   : > { %436 = shalt.err (!%p433_p11)
}
  0x3d   : > { %298 = dma.vmem_to_hbm [thread:$0]  (%p563_p3), %s194_s14, 128, %s196_s17, %s181_s18  }
  0x3e PF: > { %s207_s29 = sand.u32 1, %s467_s9   ;;  %p643_p12 = scmp.ge.s32.totalorder %s479_s12, 2 }
  0x3f   : > { %s208_s28 = scalar_lea.sflag [#allocation4], %s207_s29 }
  0x40   : > { %p309_p13 = pnand %p643_p12, %p532_p6 }
  0x42   : > { %p310_p0 = pneg %p309_p13 }
  0x44   : > { %462 = dma.done.wait (%p310_p0), %s208_s28, 128  }
  0x45   : > { %464 = vsyncadd (%p310_p0), %s208_s28, 4294967168  ;;  %p16_p5 = scmp.ge.s32.totalorder %s550_s23, 4   ;;  %s644_s9 = smov %s471_s10 }
  0x46   : > { %s645_s10 = smov %s475_s11  ;;  %s646_s11 = smov %s559_s26 }
  0x47   : > { %s647_s12 = smov %s550_s23  ;;  %18 = sbr.rel (!%p16_p5) target bundleno = 6 (0x6), region = 78 }
  0x4c   :  { %214 = vsyncpa [#allocation3], 1 }
  0x4d   :  { %216 = vsyncpa [#allocation3 + $0x1], 1 }
  0x4e   :  { %217 = vsyncpa [#allocation6], 1 }
  0x4f   :  { %219 = vsyncpa [#allocation6 + $0x1], 1 }
  0x50   :  { %220 = vsyncpa [#allocation4], 1 }
  0x51   :  { %222 = vsyncpa [#allocation4 + $0x1], 1 }

// kernel: tpu_custom_call.1
= control target key start
LH: loop header
LB: loop body
LE: loop exit
PB: predicated region body
PF: predicated region fallthrough
CT: control target
= control target key end

     0   :  { %s1745_s0 = inlined_call_operand.hbm [shape: bf16[2,8,32], index: 0, kind: input, shape index: {}]   ;;  %s1746_s1 = inlined_call_operand.hbm [shape: bf16[2,8,32], index: 1, kind: input, shape index: {}]   ;;  %s1747_s2 = inlined_call_operand.hbm [shape: f32[2,1,8], index: 2, kind: input, shape index: {}]   ;;  %s1748_s3 = inlined_call_operand.hbm [shape: bf16[32,96], index: 3, kind: input, shape index: {}]   ;;  %s1749_s4 = inlined_call_operand.vmem [shape: f32[1,96], index: 4, kind: input, shape index: {}]   ;;  %s1750_s5 = inlined_call_operand.hbm [shape: bf16[32,32], index: 5, kind: input, shape index: {}]   ;;  %s1751_s6 = inlined_call_operand.vmem [shape: f32[1,32], index: 6, kind: input, shape index: {}]   ;;  %s1752_s7 = inlined_call_operand.vmem [shape: f32[1,32], index: 7, kind: input, shape index: {}]   ;;  %s1753_s8 = inlined_call_operand.vmem [shape: f32[1,32], index: 8, kind: input, shape index: {}]   ;;  %s1754_s9 = inlined_call_operand.hbm [shape: bf16[2,8,32], index: 9, kind: output, shape index: {}]  }
   0x1   :  { %1766 = sst [smem:[#allocation24_spill]] %s1746_s1 }
   0x2   :  { %1767 = sst [smem:[#allocation25_spill]] %s1748_s3 }
   0x3   :  { %1768 = sst [smem:[#allocation26_spill]] %s1750_s5 }
   0x4   :  { %1769 = sst [smem:[#allocation27_spill]] %s1752_s7 }
   0x5   :  { %1770 = sst [smem:[#allocation28_spill]] %s1753_s8 }
   0x6   :  { %1771 = sst [smem:[#allocation29_spill]] %s1754_s9 }
   0x7   :  { %14 = vsyncpa [#allocation3], 0 }
   0x8   :  { %16 = vsyncpa [#allocation3 + $0x1], 0 }
   0x9   :  { %17 = vsyncpa [#allocation6], 0 }
   0xa   :  { %19 = vsyncpa [#allocation6 + $0x1], 0 }
   0xb   :  { %20 = vsyncpa [#allocation9], 0 }
   0xc   :  { %21 = vsyncpa [#allocation4], 0 }
   0xd   :  { %23 = vsyncpa [#allocation4 + $0x1], 0  ;;  %s1495_s30 = smov 0   ;;  %s1497_s10 = smov 0  }
   0xe   :  { %s1499_s11 = smov 0   ;;  %s1501_s12 = smov 0  }
   0xf   :  { %s1503_s13 = smov 0   ;;  %s1505_s14 = smov 0  }
  0x10 LB: > { %1772 = sst [smem:[#allocation16_spill]] %s1404_s30  ;;  %s1526_s15 = sadd.s32 4294967295, %s1424_s14   ;;  %s1424_s14 = sphi %s1505_s14, %s29_s14   ;;  %s1420_s13 = sphi %s1503_s13, %s1808_s13   ;;  %s1416_s12 = sphi %s1501_s12, %s1807_s12   ;;  %s1412_s11 = sphi %s1499_s11, %s1806_s11   ;;  %s1408_s10 = sphi %s1497_s10, %s1805_s10   ;;  %s1404_s30 = sphi %s1495_s30, %s1804_s30  }
  0x11   : > { %1773 = sst [smem:[#allocation17_spill]] %s1412_s11  ;;  %p1002_p0 = scmp.ge.s32.totalorder %s1424_s14, 1 }
  0x12   : > { %1774 = sst [smem:[#allocation18_spill]] %s1416_s12  ;;  %p64_p1 = scmp.eq.s32.totalorder %s1526_s15, 0 }
  0x13   : > { %1775 = sst [smem:[#allocation19_spill]] %s1424_s14  ;;  %p280_p2 = scmp.lt.s32.totalorder %s1424_s14, 3 }
  0x14   : > { %s1776_s3 = sld [smem:[#allocation25_spill]]  ;;  %s1426_s20 = smov [#allocation8]  }
  0x15   : > { %p1534_p3 = pnand %p1002_p0, %p280_p2  ;;  %s293_s21 = sshll.u32 %s1426_s20, 4  ;;  %s294_s21 = int_to_ptr.vmem [resolvable:$true] %s293_s21 }
  0x16   : > { %s1755_s23 = smov 64   ;;  %s1756_s24 = smov 4  }
  0x17   : > { %p1065_p4 = pneg %p1534_p3  ;;  %s1001_s25 = sadd.s32 4294967294, %s1424_s14  }
  0x18   : > { %s41_s26 = sadd.s32 1, %s1420_s13  ;;  %s50_s27 = sadd.s32 1, %s1412_s11 }
  0x19   : > { %p1542_p5 = pnand %p1065_p4, %p64_p1  ;;  %p43_p7 = scmp.ge.s32.totalorder %s41_s26, 2 }
  0x1a   : > { %s291_s18 = sshll.u32 %s1776_s3, 4  ;;  %p57_p8 = scmp.ne.s32.totalorder %s1412_s11, %s1408_s10  ;;  %s292_s18 = int_to_ptr.hbm [resolvable:$true] %s291_s18 }
  0x1b   : > { %1068 = dma.hbm_to_vmem [thread:$0]  (!%p1542_p5), %s292_s18, 256, %s294_s21, [#allocation9], %s1755_s23, %s1755_s23, %s1756_s24  }
  0x1c   : > { %p58_p9 = scmp.eq.s32.totalorder %s1424_s14, 0  ;;  %p63_p10 = scmp.ne.s32.totalorder %s1408_s10, %s1404_s30 }
  0x1d   : > { %s1810_s26 = smov (%p43_p7, %s41_s26), 0  ;;  %p267_p13 = scmp.eq.s32.totalorder %s1526_s15, 1 }
  0x1e   : > { %1779 = sst [smem:[#allocation20_spill]] %s1810_s26  ;;  %p1562_p11 = por %p58_p9, %p57_p8 }
  0x1f   : > { %p1568_p12 = por %p64_p1, %p63_p10  ;;  %s45_s16 = ssub.s32 %s1420_s13, %s1810_s26 }
  0x20   : > { %p48_p0 = scmp.eq.s32.totalorder %s45_s16, 0  ;;  %p273_p2 = scmp.eq.s32.totalorder %s1001_s25, 1 }
  0x21   : > { %p1575_p4 = por %p267_p13, %p57_p8  ;;  %p1088_p7 = scmp.lt.s32.totalorder %s1424_s14, 2 }
  0x22   : > { %s1581_s18 = scalar_select %p48_p0, %s1412_s11, %s50_s27  }
  0x23   : > { %s1782_s17 = scalar_select %p1575_p4, 1, 0 }
  0x24   : > { %1784 = sst [smem:[#allocation22_spill]] %s1581_s18  ;;  %p1583_p9 = por %p273_p2, %p63_p10 }
  0x25   : > { %1783 = sst [smem:[#allocation21_spill]] %s1782_s17  ;;  %s1588_s21 = sand.u32 1, %s1412_s11  }
  0x26   : > { %s1785_s20 = scalar_select %p1583_p9, 1, 0 }
  0x27   : > { %s1006_s23 = sshll.u32 %s1588_s21, 2  ;;  %s1007_s24 = sshll.u32 %s1420_s13, 2 }
  0x28   : > { %1786 = sst [smem:[#allocation23_spill]] %s1785_s20  ;;  %p1594_p6 = pnand %p1088_p7, %p1562_p11 }
  0x29   : > { %s353_s16 = sand.u32 1, %s1424_s14   ;;  %s1788_s1 = sld [smem:[#allocation24_spill]] }
  0x2a   : > { %s357_s30 = scalar_lea.vmem [#allocation5], %s1006_s23  ;;  %s354_s11 = scalar_lea.sflag [#allocation6], %s353_s16 }
  0x2b   : > { %s365_s20 = sshll.u32 %s357_s30, 4  ;;  %s1789_s5 = sld [smem:[#allocation26_spill]]  ;;  %s366_s20 = int_to_ptr.vmem [resolvable:$true] %s365_s20 }
  0x2c   : > { %s1429_s14 = smov [#allocation10]   ;;  %s1791_s30 = smov 64  }
  0x2d   : > { %s310_s3 = sshll.u32 %s1429_s14, 4  ;;  %s334_s17 = scalar_lea.sflag [#allocation3], %s1588_s21  ;;  %s311_s3 = int_to_ptr.vmem [resolvable:$true] %s310_s3 }
  0x2e   : > { %s378_s22 = scalar_lea.hbm %s1747_s2, %s1420_s13  ;;  %s375_s7 = scalar_lea.vmem [#allocation7], %s1588_s21 }
  0x2f   : > { %s361_s26 = scalar_lea.hbm %s1788_s1, %s1007_s24  ;;  %s342_s1 = scalar_lea.hbm %s1745_s0, %s1007_s24 }
  0x30   : > { %s363_s18 = sshll.u32 %s361_s26, 4  ;;  %s1790_s26 = smov 4   ;;  %s364_s18 = int_to_ptr.hbm [resolvable:$true] %s363_s18 }
  0x31   : > { %1078 = dma.hbm_to_vmem [thread:$0]  (!%p1594_p6), %s364_s18, 64, %s366_s20, %s354_s11  }
  0x32   : > { %s308_s9 = sshll.u32 %s1789_s5, 4  ;;  %s344_s18 = sshll.u32 %s342_s1, 4  ;;  %s309_s9 = int_to_ptr.hbm [resolvable:$true] %s308_s9  ;;  %s345_s18 = int_to_ptr.hbm [resolvable:$true] %s344_s18 }
  0x33   : > { %1071 = dma.hbm_to_vmem [thread:$0]  (!%p1542_p5), %s309_s9, 256, %s311_s3, [#allocation9], %s1791_s30, %s1791_s30, %s1790_s26  }
  0x34   : > { %s337_s20 = scalar_lea.vmem [#allocation2], %s1006_s23  ;;  %s380_s5 = sshll.u32 %s378_s22, 4  ;;  %s381_s5 = int_to_ptr.hbm [resolvable:$true] %s380_s5 }
  0x35   : > { %s346_s8 = sshll.u32 %s337_s20, 4  ;;  %s382_s12 = sshll.u32 %s375_s7, 4  ;;  %s347_s8 = int_to_ptr.vmem [resolvable:$true] %s346_s8  ;;  %s383_s12 = int_to_ptr.vmem [resolvable:$true] %s382_s12 }
  0x36   : > { %1075 = dma.hbm_to_vmem [thread:$0]  (!%p1594_p6), %s345_s18, 64, %s347_s8, %s334_s17  }
  0x37   : > { %1081 = dma.hbm_to_vmem [thread:$0]  (!%p1594_p6), %s381_s5, 16, %s383_s12, %s354_s11  }
  0x38   : > { %391 = sbr.rel (%p1534_p3) target bundleno = 1415 (0x587), region = 56  ;;  %s1628_s1 = sand.u32 (!%p1534_p3), 1, %s1408_s10  }
  0x39   : > { %s1011_s8 = sshll.u32 (!%p1534_p3), %s1628_s1, 2  ;;  %s394_s9 = scalar_lea.sflag (!%p1534_p3), [#allocation3], %s1628_s1 }
  0x3a   : > { %s397_s23 = scalar_lea.vmem (!%p1534_p3), [#allocation2], %s1011_s8 }
  0x3d   : > { %1387 = dma.done.wait (%p1568_p12), %s394_s9, 64  }
  0x3e   : > { %1389 = vsyncadd (%p1568_p12), %s394_s9, 4294967232  ;;  %s403_s5 = sand.u32 1, %s1526_s15  }
  0x3f   : > { %s404_s7 = scalar_lea.sflag [#allocation6], %s403_s5 }
  0x40   : > { %1391 = dma.done.wait (%p1568_p12), %s404_s7, 80  }
  0x41   : > { %1393 = vsyncadd (%p1568_p12), %s404_s7, 4294967216  ;;  %s416_s11 = scalar_lea.vmem [#allocation7], %s1628_s1 }
  0x42   : > { %1395 = dma.done.wait (%p64_p1), [#allocation9], 512  }
  0x43   : > { %1397 = vsyncadd (%p64_p1), [#allocation9], 4294966784  ;;  %v1046_v0 = vld [vmem:[#allocation8 + $0x8] sm:$0xff]  ;;  %v1045_v1 = vld [vmem:[#allocation8] sm:$0xff]  ;;  %vm493_vm0 = vcmask 261120   ;;  %s1430_s15 = smov 96  }
  0x44   : > { %503 = vmatpush.bf16.msra.mxu0 %v1046_v0  ;;  %v1648_v2 = vld [vmem:[%s397_s23] sm:$0xf]  ;;  %s1431_s24 = smov 104   ;;  %s1432_s29 = smov 120   ;;  %vm522_vm1 = vcmask 64512   ;;  %vm559_vm2 = vcmask 1043456  }
  0x45   : > { %v1159_v3 = vld [vmem:[%s1749_s4] ss:$0 sm:$0xff]  ;;  %s1433_s21 = smov 88   ;;  %s1434_s25 = smov 80   ;;  %vm760_vm3 = vcmask 130048   ;;  %vm762_vm4 = vcmask 195584  }
  0x46   : > { %s1435_s3 = smov 72   ;;  %s1436_s26 = smov 112   ;;  %v1160_v25 = vld [vmem:[%s416_s11] ss:$0 sm:$0xff]  ;;  %vm843_vm9 = vcmask 257024  }
  0x47   : > { %s1437_s30 = smov 64   ;;  %s1438_s27 = smov 40  }
  0x48   : > { %504 = vmatpush.bf16.msra.mxu0 %v1045_v1  ;;  %s1439_s16 = smov 56   ;;  %s1440_s18 = smov 48  }
  0x49   : > { %s1441_s20 = smov 8   ;;  %s1442_s17 = smov 16  }
  0x4a   : > { %s1443_s14 = smov 24   ;;  %s1792_s9 = sld [smem:[#allocation18_spill]] }
  0x4b   : > { %1023 = vmatmul.msk.bf16.vlgmr.msra.gmra.mxu0 %vm493_vm0, %v1648_v2  ;;  %s1793_s11 = sld [smem:[#allocation27_spill]] }
  0x50   : > { %s1042_s23 = sshll.u32 %s1792_s9, 2 }
  0xc8   : > { %v506_v4 = vpop.f32.mrf.mxu0 }
  0xc9   : > { %v507_v5 = vadd.f32 %v1159_v3, %v506_v4 }
  0xcb   : > { %v510_v6 = vmul.f32 0.35355338, %v507_v5  ;;  %v512_v7 = vpack.c.bf16 %v507_v5, %v507_v5 }
  0xcd   : > { %v511_v8 = vpack.c.bf16 %v510_v6, %v510_v6  ;;  %v518_v9 = vunpack.c.l.b16 %v512_v7 }
  0xcf   : > { %v1655_v10 = vpack.c.b16 %v518_v9, %v518_v9  ;;  %v577_v11 = vunpack.c.l.b16 %v511_v8 }
  0xd0   : > { %v508_v12 = vpop.f32.mrf.mxu0 }
  0xd1   : > { %520 = vrot.lane.b32.xlu0 %v1655_v10, %s1430_s15  ;;  %v578_v13 = vpack.c.b16 %v577_v11, %v577_v11  ;;  %s1794_s15 = sld [smem:[#allocation28_spill]] }
  0xd3   : > { %691 = vrot.lane.b32.xlu2 %v578_v13, %s1431_s24  ;;  %579 = vrot.lane.b32.xlu1 %v578_v13, %s1432_s29 }
  0xd9   : > { %581 = vrot.lane.b32.xlu0 %v1655_v10, %s1433_s21  ;;  %s1795_s21 = sld [smem:[#allocation29_spill]] }
  0xdb   : > { %637 = vrot.lane.b32.xlu2 %v1655_v10, %s1434_s25  ;;  %693 = vrot.lane.b32.xlu1 %v1655_v10, %s1435_s3 }
  0xdf   : > { %s857_s25 = scalar_lea.hbm %s1795_s21, %s1042_s23 }
  0xe1   : > { %635 = vrot.lane.b32.xlu0 %v578_v13, %s1436_s26  ;;  %s470_s26 = scalar_lea.vmem [#allocation11], %s1011_s8  ;;  %s1354_s8 = scalar_lea.hbm %s1795_s21, 8 }
 0x12d   : > { %v692_v14 = vpop.permute.xlu2 %691 }
 0x135   : > { %v638_v15 = vpop.permute.xlu2 %637 }
 0x136   : > { %v643_v16 = vsel %vm522_vm1, %v638_v15, 0 }
 0x137   : > { %652 = vmatpush.bf16.xpose.msrb.mxu0 %v643_v16 }
 0x143   : > { %v521_v17 = vpop.permute.xlu0 %520 }
 0x144   : > { %v527_v18 = vsel %vm522_vm1, %v521_v17, 0 }
 0x145   : > { %536 = vmatpush.bf16.xpose.msra.mxu1 %v527_v18  ;;  %v580_v19 = vpop.permute.xlu1 %579 }
 0x14b   : > { %v582_v20 = vpop.permute.xlu0 %581 }
 0x14c   : > { %1024 = vmatmul.msk.bf16.vlgmr.msra.gmra.mxu1 %vm522_vm1, %v511_v8  ;;  %v587_v21 = vsel %vm522_vm1, %v582_v20, 0 }
 0x14d   : > { %596 = vmatpush.bf16.xpose.msra.mxu3 %v587_v21  ;;  %v694_v22 = vpop.permute.xlu1 %693 }
 0x14e   : > { %v699_v23 = vsel %vm522_vm1, %v694_v22, 0 }
 0x153   : > { %v636_v24 = vpop.permute.xlu0 %635 }
 0x154   : > { %1026 = vmatmul.msk.bf16.vlgmr.msra.gmra.mxu3 %vm522_vm1, %v580_v19  ;;  %1028 = vmatmul.msk.bf16.vlgmr.msrb.gmra.mxu0 %vm522_vm1, %v636_v24 }
 0x155   : > { %708 = vmatpush.bf16.xpose.msrb.mxu3 %v699_v23 }
 0x164   : > { %1030 = vmatmul.msk.bf16.vlgmr.msrb.gmra.mxu3 %vm522_vm1, %v692_v14 }
 0x1c9   : > { %v538_v26 = vpop.f32.mrf.mxu1 }
 0x1ca   : > { %v539_v27 = vadd.f32 %v1160_v25, %v538_v26 }
 0x1cc   : > { %v542_v28 = vsel %vm522_vm1, %v539_v27, -inf }
 0x1cd   : > { %543 = vmax.xlane.f32.xlu1 %v542_v28 }
 0x1d1   : > { %v540_v29 = vpop.f32.mrf.mxu1  ;;  %v654_v30 = vpop.f32.mrf.mxu0 }
 0x1d2   : > { %v655_v35 = vadd.f32 %v1160_v25, %v654_v30 }
 0x1d4   : > { %v658_v37 = vsel %vm522_vm1, %v655_v35, -inf }
 0x1d7   : > { %v598_v31 = vpop.f32.mrf.mxu3 }
 0x1d8   : > { %v599_v32 = vadd.f32 %v1160_v25, %v598_v31  ;;  %v1048_v31 = vld [vmem:[#allocation10 + $0x8] sm:$0xff] }
 0x1d9   : > { %v656_v33 = vpop.f32.mrf.mxu0  ;;  %794 = vmatpush.bf16.msra.mxu0 %v1048_v31 }
 0x1da   : > { %v602_v34 = vsel %vm522_vm1, %v599_v32, -inf }
 0x1db   : > { %603 = vmax.xlane.f32.xlu2 %v602_v34 }
 0x1df   : > { %v600_v36 = vpop.f32.mrf.mxu3 }
 0x1e3   : > { %659 = vmax.xlane.f32.xlu2 %v658_v37 }
 0x1e7   : > { %v710_v38 = vpop.f32.mrf.mxu3 }
 0x1e8   : > { %v711_v39 = vadd.f32 %v1160_v25, %v710_v38 }
 0x1ea   : > { %v714_v40 = vsel %vm522_vm1, %v711_v39, -inf }
 0x1eb   : > { %715 = vmax.xlane.f32.xlu0 %v714_v40  ;;  %v1161_v40 = vld [vmem:[%s1751_s6] ss:$0 sm:$0xff] }
 0x1ef   : > { %v712_v41 = vpop.f32.mrf.mxu3 }
 0x1f0   : > { %v801_v41 = vunpack.c.l.bf16 %v1648_v2 }
 0x1fb   : > { %554 = vrot.lane.b32.xlu2 %v1655_v10, %s1437_s30  ;;  %s859_s30 = sshll.u32 %s470_s26, 4  ;;  %s860_s30 = int_to_ptr.vmem [resolvable:$true] %s859_s30 }
 0x203   : > { %726 = vrot.lane.b32.xlu2 %v1655_v10, %s1438_s27  ;;  %s861_s27 = sshll.u32 %s857_s25, 4  ;;  %s862_s27 = int_to_ptr.hbm [resolvable:$true] %s861_s27 }
 0x240   : > { %v544_v42 = vpop.xlane.xlu1 %543 }
 0x241   : > { %v545_v43 = vsub.f32 %v539_v27, %v544_v42 }
 0x243   : > { %v546_v44 = vmul.f32 1.442695, %v545_v43 }
 0x245   : > { %1164 = vpow2.f32 %v546_v44 }
 0x24b   : > { %v1165_v45 = vpop.eup %1164 }
 0x24c   : > { %v548_v46 = vsel %vm522_vm1, %v1165_v45, 0.0 }
 0x24d   : > { %549 = vadd.xlane.f32.xlu1 %v548_v46 }
 0x24e   : > { %v604_v47 = vpop.xlane.xlu2 %603 }
 0x24f   : > { %v605_v50 = vsub.f32 %v599_v32, %v604_v47  ;;  %v1047_v32 = vld [vmem:[#allocation10] sm:$0xff]  ;;  %v1444_v47 = vmov 32.0  }
 0x250   : > { %795 = vmatpush.bf16.msra.mxu0 %v1047_v32 }
 0x251   : > { %v606_v52 = vmul.f32 1.442695, %v605_v50 }
 0x256   : > { %v660_v48 = vpop.xlane.xlu2 %659 }
 0x257   : > { %v661_v49 = vsub.f32 %v655_v35, %v660_v48 }
 0x259   : > { %v662_v51 = vmul.f32 1.442695, %v661_v49 }
 0x25b   : > { %1166 = vpow2.f32 %v662_v51 }
 0x25c   : > { %1168 = vpow2.f32 %v606_v52 }
 0x25e   : > { %v555_v53 = vpop.permute.xlu2 %554  ;;  %v716_v54 = vpop.xlane.xlu0 %715 }
 0x25f   : > { %v561_v55 = vsel %vm559_vm2, %v555_v53, 0  ;;  %v717_v57 = vsub.f32 %v711_v39, %v716_v54 }
 0x260   : > { %570 = vmatpush.bf16.msra.mxu2 %v561_v55 }
 0x261   : > { %v1167_v56 = vpop.eup %1166  ;;  %v718_v59 = vmul.f32 1.442695, %v717_v57 }
 0x262   : > { %v664_v58 = vsel %vm522_vm1, %v1167_v56, 0.0  ;;  %v1169_v60 = vpop.eup %1168 }
 0x263   : > { %665 = vadd.xlane.f32.xlu0 %v664_v58  ;;  %1170 = vpow2.f32 %v718_v59  ;;  %v608_v61 = vsel %vm522_vm1, %v1169_v60, 0.0 }
 0x266   : > { %614 = vrot.lane.b32.xlu1 %v1655_v10, %s1439_s16  ;;  %v727_v6 = vpop.permute.xlu2 %726  ;;  %s846_s16 = scalar_lea.sflag [#allocation4], %s1628_s1 }
 0x267   : > { %v732_v9 = vsel %vm559_vm2, %v727_v6, 0  ;;  %v1163_v6 = vld [vmem:[%s1794_s15] ss:$0 sm:$0xff] }
 0x269   : > { %v1171_v62 = vpop.eup %1170 }
 0x26a   : > { %v720_v63 = vsel %vm522_vm1, %v1171_v62, 0.0 }
 0x26b   : > { %609 = vadd.xlane.f32.xlu0 %v608_v61 }
 0x273   : > { %721 = vadd.xlane.f32.xlu0 %v720_v63 }
 0x287   : > { %670 = vrot.lane.b32.xlu0 %v1655_v10, %s1440_s18  ;;  %s1348_s18 = sshra.s32 %s862_s27, 4  ;;  %s1349_s18 = int_to_ptr.hbm [resolvable:$true] %s1348_s18 }
 0x288   : > { %p1355_p6 = scmp.lt.s32.totalorder %s1349_s18, %s1795_s21 }
 0x2c0   : > { %v550_v0 = vpop.xlane.xlu1 %549 }
 0x2c1   : > { %1172 = vrcp.f32 %v550_v0 }
 0x2c7   : > { %v1173_v1 = vpop.eup %1172 }
 0x2c8   : > { %v552_v3 = vmul.f32 %v1173_v1, %v1165_v45 }
 0x2ca   : > { %v553_v4 = vpack.c.bf16 %v552_v3, %v552_v3 }
 0x2cc   : > { %1025 = vmatmul.msk.bf16.vlgmr.msra.gmra.mxu2 %vm522_vm1, %v553_v4  ;;  %v1162_v4 = vld [vmem:[%s1793_s11] ss:$0 sm:$0xff] }
 0x2d6   : > { %v666_v5 = vpop.xlane.xlu0 %665 }
 0x2d8   : > { %v615_v7 = vpop.permute.xlu1 %614 }
 0x2d9   : > { %v620_v8 = vsel %vm559_vm2, %v615_v7, 0 }
 0x2da   : > { %629 = vmatpush.bf16.msrb.mxu2 %v620_v8 }
 0x2de   : > { %741 = vmatpush.bf16.msra.mxu2 %v732_v9  ;;  %v610_v11 = vpop.xlane.xlu0 %609 }
 0x2df   : > { %1174 = vrcp.f32 %v610_v11 }
 0x2e5   : > { %v1175_v12 = vpop.eup %1174 }
 0x2e6   : > { %v612_v10 = vmul.f32 %v1175_v12, %v1169_v60  ;;  %v722_v13 = vpop.xlane.xlu0 %721 }
 0x2e7   : > { %1176 = vrcp.f32 %v722_v13 }
 0x2e8   : > { %v613_v14 = vpack.c.bf16 %v612_v10, %v612_v10  ;;  %1178 = vrcp.f32 %v666_v5 }
 0x2e9   : > { %1180 = vrcp.f32 %v1444_v47 }
 0x2ea   : > { %1027 = vmatmul.msk.bf16.vlgmr.msrb.gmra.mxu2 %vm522_vm1, %v613_v14 }
 0x2ed   : > { %v1177_v15 = vpop.eup %1176 }
 0x2ee   : > { %v724_v16 = vmul.f32 %v1177_v15, %v1171_v62  ;;  %v1179_v17 = vpop.eup %1178 }
 0x2ef   : > { %v668_v18 = vmul.f32 %v1179_v17, %v1167_v56  ;;  %v1181_v48 = vpop.eup %1180 }
 0x2f0   : > { %v725_v19 = vpack.c.bf16 %v724_v16, %v724_v16  ;;  %v807_v49 = vmul.f32 32.0, %v1181_v48  ;;  %vm811_vm5 = vweird.f32 %v1181_v48 }
 0x2f1   : > { %v669_v22 = vpack.c.bf16 %v668_v18, %v668_v18 }
 0x2f2   : > { %v808_v50 = vsub.f32 1.0, %v807_v49 }
 0x2f4   : > { %v809_v51 = vmul.f32 %v1181_v48, %v808_v50 }
 0x2f6   : > { %v810_v52 = vadd.f32 %v1181_v48, %v809_v51 }
 0x2f8   : > { %v812_v53 = vsel %vm811_vm5, %v1181_v48, %v810_v52 }
 0x2f9   : > { %v671_v20 = vpop.permute.xlu0 %670 }
 0x2fa   : > { %1031 = vmatmul.msk.bf16.vlgmr.msra.gmra.mxu2 %vm522_vm1, %v725_v19  ;;  %v676_v21 = vsel %vm559_vm2, %v671_v20, 0 }
 0x2fb   : > { %685 = vmatpush.bf16.msrb.mxu1 %v676_v21 }
 0x2fe   : > { %1029 = vmatmul.msk.bf16.vlgmr.msrb.gmra.mxu1 %vm522_vm1, %v669_v22 }
 0x34f   : > { %v572_v23 = vpop.f32.mrf.mxu2 }
 0x357   : > { %v574_v24 = vpop.f32.mrf.mxu2 }
 0x36d   : > { %v631_v25 = vpop.f32.mrf.mxu2 }
 0x36e   : > { %748 = vrot.lane.b32.xlu1 %v631_v25, %s1441_s20  ;;  %s1350_s20 = scalar_lea.hbm %s1349_s18, 4 }
 0x36f   : > { %p1351_p1 = scmp.ne.s32.totalorder %s1349_s18, %s1350_s20  ;;  %p1356_p8 = scmp.lt.s32.totalorder %s1354_s8, %s1350_s20 }
 0x371   : > { %p1352_p3 = pnand %p1351_p1, %p1575_p4  ;;  %p1357_p10 = por %p1356_p8, %p1355_p6 }
 0x373   : > { %p1353_p5 = pneg %p1352_p3 }
 0x375   : > { %v633_v26 = vpop.f32.mrf.mxu2  ;;  %p1358_p11 = pnand %p1357_p10, %p1353_p5 }
 0x37b   : > { %v687_v27 = vpop.f32.mrf.mxu1 }
 0x37c   : > { %752 = vrot.lane.b32.xlu2 %v687_v27, %s1442_s17 }
 0x37d   : > { %v743_v28 = vpop.f32.mrf.mxu2 }
 0x37e   : > { %756 = vrot.lane.b32.xlu1 %v743_v28, %s1443_s14 }
 0x383   : > { %v689_v29 = vpop.f32.mrf.mxu1 }
 0x385   : > { %v745_v30 = vpop.f32.mrf.mxu2 }
 0x3d6   : > { %v753_v35 = vpop.permute.xlu2 %752 }
 0x3e0   : > { %v749_v33 = vpop.permute.xlu1 %748 }
 0x3e1   : > { %v759_v34 = vsel %vm522_vm1, %v572_v23, %v749_v33 }
 0x3e2   : > { %v761_v36 = vsel %vm760_vm3, %v759_v34, %v753_v35 }
 0x3f0   : > { %v757_v37 = vpop.permute.xlu1 %756 }
 0x3f1   : > { %v763_v38 = vsel %vm762_vm4, %v761_v36, %v757_v37 }
 0x3f2   : > { %v764_v39 = vpack.c.bf16 %v763_v38, %v763_v38 }
 0x3f4   : > { %1040 = vmatmul.msk.bf16.vlgmr.msra.gmra.mxu0 %vm493_vm0, %v764_v39 }
 0x471   : > { %v797_v42 = vpop.f32.mrf.mxu0 }
 0x472   : > { %v798_v43 = vadd.f32 %v1161_v40, %v797_v42 }
 0x474   : > { %v802_v44 = vadd.f32 %v801_v41, %v798_v43 }
 0x476   : > { %v803_v45 = vsel %vm493_vm0, %v802_v44, 0.0 }
 0x477   : > { %804 = vadd.xlane.f32.xlu2 %v803_v45 }
 0x479   : > { %v799_v46 = vpop.f32.mrf.mxu0 }
 0x4ea   : > { %v805_v54 = vpop.xlane.xlu2 %804 }
 0x4eb   : > { %v813_v55 = vmul.f32 %v812_v53, %v805_v54 }
 0x4ed   : > { %v814_v56 = vsub.f32 %v802_v44, %v813_v55 }
 0x4ef   : > { %v815_v2 = vmul.f32 %v814_v56, %v814_v56 }
 0x4f1   : > { %v816_v57 = vsel %vm493_vm0, %v815_v2, 0.0 }
 0x4f2   : > { %817 = vadd.xlane.f32.xlu1 %v816_v57 }
 0x565   : > { %v818_v58 = vpop.xlane.xlu1 %817 }
 0x566   : > { %v819_v59 = vmul.f32 %v818_v58, %v812_v53 }
 0x568   : > { %v820_v60 = vadd.f32 1e-05, %v819_v59 }
 0x56a   : > { %1182 = vrsqrt.f32 %v820_v60  ;;  %vm827_vm7 = vweird.f32 %v820_v60 }
 0x570   : > { %v1183_v61 = vpop.eup %1182 }
 0x571   : > { %v822_v62 = vmul.f32 %v1183_v61, %v820_v60  ;;  %vm828_vm6 = vweird.f32 %v1183_v61 }
 0x572   : > { %vm829_vm8 = vmor %vm827_vm7, %vm828_vm6 }
 0x573   : > { %v823_v63 = vmul.f32 %v1183_v61, %v822_v62 }
 0x575   : > { %v824_v0 = vmul.f32 0.5, %v823_v63 }
 0x577   : > { %v825_v1 = vsub.f32 1.5, %v824_v0 }
 0x579   : > { %v826_v3 = vmul.f32 %v1183_v61, %v825_v1 }
 0x57b   : > { %v830_v5 = vsel %vm829_vm8, %v1183_v61, %v826_v3 }
 0x57c   : > { %v831_v7 = vmul.f32 %v830_v5, %v814_v56 }
 0x57e   : > { %v836_v8 = vmul.f32 %v1162_v4, %v831_v7 }
 0x580   : > { %v841_v9 = vadd.f32 %v1163_v6, %v836_v8 }
 0x582   : > { %v842_v11 = vpack.c.bf16 %v841_v9, %v841_v9 }
 0x584   : > { %844 = vst.msk [vmem:[%s470_s26] sm:$0xf] %vm843_vm9, %v842_v11 }
 0x585   : > { %1361 = shalt.err (!%p1358_p11)
}
 0x586   : > { %1063 = dma.vmem_to_hbm [thread:$0]  (%p1575_p4), %s860_s30, 64, %s862_s27, %s846_s16  }
 0x587 PF: > { %s1797_s1 = sld [smem:[#allocation16_spill]] }
 0x588   : > { %s1799_s23 = sld [smem:[#allocation19_spill]] }
 0x58d   : > { %s873_s5 = sand.u32 1, %s1797_s1  }
 0x58e   : > { %p1800_p12 = scmp.ge.s32.totalorder %s1799_s23, 2  ;;  %s874_s7 = scalar_lea.sflag [#allocation4], %s873_s5 }
 0x590   : > { %p1083_p13 = pnand %p1800_p12, %p1583_p9 }
 0x592   : > { %p1084_p0 = pneg %p1083_p13 }
 0x594   : > { %1399 = dma.done.wait (%p1084_p0), %s874_s7, 64  }
 0x595   : > { %1401 = vsyncadd (%p1084_p0), %s874_s7, 4294967232  ;;  %s29_s14 = sadd.s32 1, %s1799_s23   ;;  %s1801_s11 = sld [smem:[#allocation17_spill]] }
 0x596   : > { %p26_p2 = scmp.ge.s32.totalorder %s29_s14, 4   ;;  %s1802_s12 = sld [smem:[#allocation22_spill]] }
 0x597   : > { %s1803_s19 = sld [smem:[#allocation20_spill]]  ;;  %s1804_s30 = smov %s1408_s10 }
 0x599   :  { %28 = sbr.rel (!%p26_p2) target bundleno = 16 (0x10), region = 133 }
 0x59b   : > { %s1805_s10 = smov %s1801_s11 }
 0x59c   : > { %s1806_s11 = smov %s1802_s12  ;;  %s1807_s12 = smov %s1420_s13 }
 0x59d   : > { %s1808_s13 = smov %s1803_s19 }
 0x59e   :  { %880 = vsyncpa [#allocation3], 1 }
 0x59f   :  { %882 = vsyncpa [#allocation3 + $0x1], 1 }
 0x5a0   :  { %883 = vsyncpa [#allocation6], 1 }
 0x5a1   :  { %885 = vsyncpa [#allocation6 + $0x1], 1 }
 0x5a2   :  { %886 = vsyncpa [#allocation9], 1 }
 0x5a3   :  { %887 = vsyncpa [#allocation4], 1 }
 0x5a4   :  { %889 = vsyncpa [#allocation4 + $0x1], 1 }

</bundles_post_ra>
